<compile_context>
chip_gen: v7x
topology: tpu7x:2x2x1
jax: 0.10.0
libtpu: 0.0.40
codegen_flags: <defaults>
</compile_context>

<pallas_src>
import functools

import jax
import jax.numpy as jnp
from jax.experimental import pallas as pl
from jax.experimental.pallas import tpu as pltpu


def _choose_block(full, unit, max_blk):
    """Largest divisor of `full` that is a multiple of `unit` and <= max_blk.

    Falls back to the full dimension when `full` is not a multiple of `unit`
    (a block equal to the array dim is always legal on TPU).
    """
    if full % unit != 0:
        return full
    blk = min(max_blk, full)
    blk -= blk % unit
    while full % blk != 0:
        blk -= unit
    return blk


# ----------------------------- phase 1: stats ------------------------------ #
def _stats_kernel(x_ref, mean_ref, new_mean_ref, inv_mean_ref, acc_ref, *,
                  momentum, bt):
    """Accumulate per-channel sum(x^2) over the (B, N) reduction grid axes.

    x_ref:        (Cblk, Nblk) block of x (B dim squeezed), input dtype
    mean_ref:     (Cblk, 1)    running mean, f32
    new_mean_ref: (Cblk, 1)    updated running mean, f32
    inv_mean_ref: (Cblk, 1)    reciprocal of the updated mean, f32
    acc_ref:      (Cblk, 1)    f32 scratch accumulator (persists across grid)
    """
    b = pl.program_id(1)
    n = pl.program_id(2)

    @pl.when(jnp.logical_and(b == 0, n == 0))
    def _():
        acc_ref[...] = jnp.zeros_like(acc_ref)

    x = x_ref[...].astype(jnp.float32)            # accumulate in f32
    acc_ref[...] += jnp.sum(x * x, axis=-1, keepdims=True)

    last = jnp.logical_and(b == pl.num_programs(1) - 1,
                           n == pl.num_programs(2) - 1)

    @pl.when(last)
    def _():
        stat = jnp.sqrt(acc_ref[...] * (1.0 / bt))          # mean over (B, T)
        new_mean = mean_ref[...] * (1.0 - momentum) + momentum * stat
        new_mean_ref[...] = new_mean
        # Done once per channel (O(C) total work, off the hot loop), so keep
        # it exact; the per-element normalize pass is then a single multiply.
        inv_mean_ref[...] = pl.reciprocal(new_mean, approx=False)


# --------------------------- phase 2: normalize ----------------------------- #
def _normalize_kernel(x_ref, inv_ref, out_ref):
    """out = x * (1/mean), broadcast per channel.  One vmul per element."""
    inv = inv_ref[...].astype(out_ref.dtype)      # (Cblk, 1), tiny
    out_ref[...] = x_ref[...] * inv


# --------------------------------- wrapper ---------------------------------- #
def qbatchnorm1d_forward(x, running_mean, *, momentum=0.1, training=True):
    """Pallas implementation of QBatchNorm1d.forward.

    x:            (B, C, T, 4, 1), any float dtype (kept as I/O dtype)
    running_mean: (1, C, 1, 1, 1), f32
    returns (out, new_running_mean) with the same shapes; in eval mode the
    running mean is returned unchanged and no reduction pass is executed.
    """
    B, C, T, Q, one = x.shape
    assert Q == 4 and one == 1
    N = T * Q

    # Trailing contiguous merge only -- no transposes, no extra HBM traffic.
    x3d = x.reshape(B, C, N)
    mean2d = running_mean.reshape(C, 1).astype(jnp.float32)

    # Tile sizes: lane dim a multiple of 128 when possible (lane-dense stores),
    # sublane dim a multiple of 8 when possible; sized well under v7x's 64 MiB
    # VMEM even with double-buffered input + output blocks.
    c_blk = _choose_block(C, 8, 256)
    n_blk = _choose_block(N, 128, 2048)
    c_tiles = C // c_blk
    n_tiles = N // n_blk
    grid = (c_tiles, B, n_tiles)

    vmem_limit = 32 * 1024 * 1024
    cp_reduce = pltpu.CompilerParams(
        dimension_semantics=("parallel", "arbitrary", "arbitrary"),
        vmem_limit_bytes=vmem_limit)
    cp_stream = pltpu.CompilerParams(
        dimension_semantics=("parallel", "parallel", "parallel"),
        vmem_limit_bytes=vmem_limit)

    x_spec = pl.BlockSpec((None, c_blk, n_blk), lambda ci, b, ni: (b, ci, ni))
    cvec_spec = pl.BlockSpec((c_blk, 1), lambda ci, b, ni: (ci, 0))

    if training:
        new_mean2d, inv2d = pl.pallas_call(
            functools.partial(_stats_kernel, momentum=float(momentum),
                              bt=float(B * T)),
            grid=grid,
            in_specs=[x_spec, cvec_spec],
            out_specs=(cvec_spec, cvec_spec),
            out_shape=(
                jax.ShapeDtypeStruct((C, 1), jnp.float32),
                jax.ShapeDtypeStruct((C, 1), jnp.float32),
            ),
            scratch_shapes=[pltpu.VMEM((c_blk, 1), jnp.float32)],
            compiler_params=cp_reduce,
        )(x3d, mean2d)
    else:
        # Eval: no reduction pass at all; (C,1) reciprocal is negligible.
        new_mean2d = mean2d
        inv2d = 1.0 / mean2d

    out3d = pl.pallas_call(
        _normalize_kernel,
        grid=grid,
        in_specs=[x_spec, cvec_spec],
        out_specs=x_spec,
        out_shape=jax.ShapeDtypeStruct((B, C, N), x.dtype),
        compiler_params=cp_stream,
    )(x3d, inv2d)

    out = out3d.reshape(B, C, T, Q, 1)
    new_mean = new_mean2d.reshape(1, C, 1, 1, 1)
    return out, new_mean


# -------------------------------- reference --------------------------------- #
def _reference(x, running_mean, momentum=0.1, training=True):
    """Pure-JAX reference mirroring the PyTorch code."""
    mean = running_mean
    if training:
        qn = jnp.sum(x.astype(jnp.float32) ** 2, axis=-2, keepdims=True)
        stat = jnp.sqrt(jnp.mean(jnp.mean(qn, axis=0, keepdims=True),
                                 axis=-3, keepdims=True))
        mean = mean * (1.0 - momentum) + momentum * stat
    return x / mean, mean


if __name__ == "__main__":
    key = jax.random.PRNGKey(0)
    B, C, T = 2, 4, 8                      # dims = (C,)
    x = jax.random.normal(key, (B, C, T, 4, 1), dtype=jnp.float32)
    running_mean = jnp.ones((1, C, 1, 1, 1), dtype=jnp.float32)  # buffer init

    # training mode
    out, new_mean = qbatchnorm1d_forward(x, running_mean,
                                         momentum=0.1, training=True)
    out = jax.block_until_ready(out)
    new_mean = jax.block_until_ready(new_mean)

    ref_out, ref_mean = _reference(x, running_mean, momentum=0.1, training=True)
    assert out.shape == x.shape and new_mean.shape == running_mean.shape
    assert jnp.allclose(out, ref_out, atol=1e-5, rtol=1e-5)
    assert jnp.allclose(new_mean, ref_mean, atol=1e-5, rtol=1e-5)

    # eval mode (no buffer update, no reduction pass)
    out_e, mean_e = qbatchnorm1d_forward(x, ref_mean, momentum=0.1,
                                         training=False)
    out_e = jax.block_until_ready(out_e)
    ref_out_e, _ = _reference(x, ref_mean, momentum=0.1, training=False)
    assert jnp.allclose(out_e, ref_out_e, atol=1e-5, rtol=1e-5)
    assert jnp.allclose(mean_e, ref_mean, atol=1e-6, rtol=1e-6)

    print("KERNEL_OK")
</pallas_src>

<mosaic_0001>
module attributes {stable_mosaic.version = 11 : i64} {
  func.func @_stats_kernel(%arg0: i32, %arg1: i32, %arg2: i32, %arg3: memref<1x4x32xf32, #tpu.memory_space<vmem>>, %arg4: memref<4x1xf32, #tpu.memory_space<vmem>>, %arg5: memref<4x1xf32, #tpu.memory_space<vmem>>, %arg6: memref<4x1xf32, #tpu.memory_space<vmem>>, %arg7: memref<4x1xf32, #tpu.memory_space<vmem>>) attributes {dimension_semantics = [#tpu.dimension_semantics<parallel>, #tpu.dimension_semantics<arbitrary>, #tpu.dimension_semantics<arbitrary>], iteration_bounds = array<i64: 1, 2, 1>, scalar_prefetch = 0 : i64, scratch_operands = 1 : i64, tpu.core_type = #tpu.core_type<tc>, window_params = [{transform_indices = @transform_0, window_bounds = array<i64: 1, 4, 32>}, {transform_indices = @transform_1, window_bounds = array<i64: 4, 1>}, {transform_indices = @transform_2, window_bounds = array<i64: 4, 1>}, {transform_indices = @transform_3, window_bounds = array<i64: 4, 1>}]} {
    %c0_i32 = arith.constant 0 : i32
    %0 = arith.cmpi eq, %arg1, %c0_i32 : i32
    %c0_i32_0 = arith.constant 0 : i32
    %1 = arith.cmpi eq, %arg2, %c0_i32_0 : i32
    %2 = arith.andi %0, %1 : i1
    %3 = arith.extui %2 : i1 to i32
    %c0_i32_1 = arith.constant 0 : i32
    %4 = arith.cmpi ne, %3, %c0_i32_1 : i32
    scf.if %4 {
      %cst_10 = arith.constant 0.000000e+00 : f32
      %18 = vector.broadcast %cst_10 : f32 to vector<4x1xf32>
      %c0_11 = arith.constant 0 : index
      %c0_12 = arith.constant 0 : index
      %19 = vector.load %arg7[%c0_11, %c0_12] : memref<4x1xf32, #tpu.memory_space<vmem>>, vector<4x1xf32>
      tpu.vector_store %arg7[%c0_11, %c0_12], %18 {strides = array<i32>} : memref<4x1xf32, #tpu.memory_space<vmem>>, vector<4x1xf32>,
    } else {
    }
    %c0 = arith.constant 0 : index
    %c0_2 = arith.constant 0 : index
    %c0_3 = arith.constant 0 : index
    %5 = vector.load %arg3[%c0, %c0_2, %c0_3] : memref<1x4x32xf32, #tpu.memory_space<vmem>>, vector<1x4x32xf32>
    %6 = vector.shape_cast %5 : vector<1x4x32xf32> to vector<4x32xf32>
    %c0_4 = arith.constant 0 : index
    %c0_5 = arith.constant 0 : index
    %7 = vector.load %arg7[%c0_4, %c0_5] : memref<4x1xf32, #tpu.memory_space<vmem>>, vector<4x1xf32>
    %8 = arith.mulf %6, %6 : vector<4x32xf32>
    %cst = arith.constant dense<0.000000e+00> : vector<4xf32>
    %9 = vector.multi_reduction <add>, %8, %cst [1] : vector<4x32xf32> to vector<4xf32>
    %10 = vector.shape_cast %9 : vector<4xf32> to vector<4x1xf32>
    %11 = arith.addf %7, %10 : vector<4x1xf32>
    %c0_6 = arith.constant 0 : index
    %c0_7 = arith.constant 0 : index
    %12 = vector.load %arg7[%c0_6, %c0_7] : memref<4x1xf32, #tpu.memory_space<vmem>>, vector<4x1xf32>
    tpu.vector_store %arg7[%c0_6, %c0_7], %11 {strides = array<i32>} : memref<4x1xf32, #tpu.memory_space<vmem>>, vector<4x1xf32>,
    %c1_i32 = arith.constant 1 : i32
    %13 = arith.cmpi eq, %arg1, %c1_i32 : i32
    %c0_i32_8 = arith.constant 0 : i32
    %14 = arith.cmpi eq, %arg2, %c0_i32_8 : i32
    %15 = arith.andi %13, %14 : i1
    %16 = arith.extui %15 : i1 to i32
    %c0_i32_9 = arith.constant 0 : i32
    %17 = arith.cmpi ne, %16, %c0_i32_9 : i32
    scf.if %17 {
      %c0_10 = arith.constant 0 : index
      %c0_11 = arith.constant 0 : index
      %18 = vector.load %arg7[%c0_10, %c0_11] : memref<4x1xf32, #tpu.memory_space<vmem>>, vector<4x1xf32>
      %cst_12 = arith.constant 6.250000e-02 : f32
      %19 = vector.broadcast %cst_12 : f32 to vector<4x1xf32>
      %20 = arith.mulf %18, %19 : vector<4x1xf32>
      %21 = math.sqrt %20 : vector<4x1xf32>
      %c0_13 = arith.constant 0 : index
      %c0_14 = arith.constant 0 : index
      %22 = vector.load %arg4[%c0_13, %c0_14] : memref<4x1xf32, #tpu.memory_space<vmem>>, vector<4x1xf32>
      %cst_15 = arith.constant 0.899999976 : f32
      %23 = vector.broadcast %cst_15 : f32 to vector<4x1xf32>
      %24 = arith.mulf %22, %23 : vector<4x1xf32>
      %cst_16 = arith.constant 1.000000e-01 : f32
      %25 = vector.broadcast %cst_16 : f32 to vector<4x1xf32>
      %26 = arith.mulf %25, %21 : vector<4x1xf32>
      %27 = arith.addf %24, %26 : vector<4x1xf32>
      %c0_17 = arith.constant 0 : index
      %c0_18 = arith.constant 0 : index
      %28 = vector.load %arg5[%c0_17, %c0_18] : memref<4x1xf32, #tpu.memory_space<vmem>>, vector<4x1xf32>
      tpu.vector_store %arg5[%c0_17, %c0_18], %27 {strides = array<i32>} : memref<4x1xf32, #tpu.memory_space<vmem>>, vector<4x1xf32>,
      %29 = tpu.reciprocal %27 : vector<4x1xf32> -> vector<4x1xf32>
      %c0_19 = arith.constant 0 : index
      %c0_20 = arith.constant 0 : index
      %30 = vector.load %arg6[%c0_19, %c0_20] : memref<4x1xf32, #tpu.memory_space<vmem>>, vector<4x1xf32>
      tpu.vector_store %arg6[%c0_19, %c0_20], %29 {strides = array<i32>} : memref<4x1xf32, #tpu.memory_space<vmem>>, vector<4x1xf32>,
    } else {
    }
    return
  }
  func.func @transform_0(%arg0: i32, %arg1: i32, %arg2: i32) -> (i32, i32, i32) {
    %c0_i32 = arith.constant 0 : i32
    return %arg1, %arg0, %arg2 : i32, i32, i32
  }
  func.func @transform_1(%arg0: i32, %arg1: i32, %arg2: i32) -> (i32, i32) {
    %c0_i32 = arith.constant 0 : i32
    %c0_i32_0 = arith.constant 0 : i32
    return %arg0, %c0_i32 : i32, i32
  }
  func.func @transform_2(%arg0: i32, %arg1: i32, %arg2: i32) -> (i32, i32) {
    %c0_i32 = arith.constant 0 : i32
    %c0_i32_0 = arith.constant 0 : i32
    return %arg0, %c0_i32 : i32, i32
  }
  func.func @transform_3(%arg0: i32, %arg1: i32, %arg2: i32) -> (i32, i32) {
    %c0_i32 = arith.constant 0 : i32
    %c0_i32_0 = arith.constant 0 : i32
    return %arg0, %c0_i32 : i32, i32
  }
}

</mosaic_0001>

<bundles_post_ra>
// kernel: tpu_custom_call.1
= control target key start
LH: loop header
LB: loop body
LE: loop exit
PB: predicated region body
PF: predicated region fallthrough
CT: control target
= control target key end

     0   :  { %9 = vsyncpa [#allocation4], 0  ;;  %s710_s0 = inlined_call_operand.hbm [shape: f32[2,4,32], index: 0, kind: input, shape index: {}]   ;;  %s711_s1 = inlined_call_operand.vmem [shape: f32[4,1], index: 1, kind: input, shape index: {}]   ;;  %s712_s2 = inlined_call_operand.vmem [shape: f32[4,1], index: 2, kind: output, shape index: {0}]   ;;  %s713_s3 = inlined_call_operand.vmem [shape: f32[4,1], index: 3, kind: output, shape index: {1}]  }
   0x1   :  { %11 = vsyncpa [#allocation4 + $0x1], 0  ;;  %s576_s12 = smov 0   ;;  %s578_s13 = smov 0  }
   0x2   :  { %s580_s14 = smov 0   ;;  %s582_s15 = smov 0  }
   0x3   :  { %s584_s16 = smov 0   ;;  %s586_s17 = smov 0  }
   0x4 LB: > { %s396_s18 = sadd.s32 4294967295, %s552_s17   ;;  %s32_s19 = sadd.s32 1, %s548_s16  ;;  %s552_s17 = sphi %s586_s17, %s17_s17   ;;  %s548_s16 = sphi %s584_s16, %s723_s16   ;;  %s544_s15 = sphi %s582_s15, %s722_s15   ;;  %s540_s14 = sphi %s580_s14, %s721_s14   ;;  %s536_s13 = sphi %s578_s13, %s720_s13   ;;  %s532_s12 = sphi %s576_s12, %s719_s12  }
   0x5   : > { %p34_p0 = scmp.ge.s32.totalorder %s32_s19, 2  ;;  %s47_s20 = sadd.s32 1, %s540_s14 }
   0x6   : > { %p54_p1 = scmp.ne.s32.totalorder %s540_s14, %s536_s13  ;;  %p55_p2 = scmp.eq.s32.totalorder %s552_s17, 0 }
   0x7   : > { %s725_s19 = smov (%p34_p0, %s32_s19), 0  ;;  %p60_p4 = scmp.ne.s32.totalorder %s536_s13, %s532_s12 }
   0x8   : > { %p612_p3 = por %p55_p2, %p54_p1  ;;  %s40_s22 = ssub.s32 %s548_s16, %s725_s19 }
   0x9   : > { %p61_p5 = scmp.eq.s32.totalorder %s396_s18, 0  ;;  %p45_p6 = scmp.eq.s32.totalorder %s40_s22, 0 }
   0xa   : > { %p418_p8 = scmp.lt.s32.totalorder %s552_s17, 2  ;;  %s169_s25 = sand.u32 1, %s540_s14  }
   0xb   : > { %p619_p7 = por %p61_p5, %p60_p4  ;;  %s401_s26 = sshll.u32 %s548_s16, 6 }
   0xc   : > { %s625_s24 = scalar_select %p45_p6, %s540_s14, %s47_s20  }
   0xd   : > { %s400_s27 = sshll.u32 %s169_s25, 2  ;;  %s632_s30 = scalar_lea.hbm %s710_s0, %s401_s26 }
   0xe   : > { %s173_s4 = scalar_lea.vmem [#allocation3], %s400_s27  ;;  %p636_p9 = pnand %p418_p8, %p612_p3 }
   0xf   : > { %s182_s5 = sshll.u32 %s173_s4, 4  ;;  %s170_s7 = scalar_lea.sflag [#allocation4], %s169_s25  ;;  %s640_s5 = int_to_ptr.vmem [resolvable:$true] %s182_s5 }
  0x10   : > { %s472_s8 = scalar_lea.hbm %s632_s30, 64  ;;  %p474_p13 = pneg %p636_p9 }
  0x11   : > { %p473_p12 = scmp.ne.s32.totalorder %s632_s30, %s472_s8  ;;  %s477_s11 = scalar_lea.hbm %s710_s0, 128 }
  0x12   : > { %p478_p2 = scmp.lt.u32.totalorder %s632_s30, %s710_s0  ;;  %p479_p3 = scmp.lt.u32.totalorder %s477_s11, %s472_s8 }
  0x13   : > { %p475_p0 = pnand %p474_p13, %p473_p12  ;;  %p481_p5 = scmp.lt.u32.totalorder %s472_s8, %s632_s30 }
  0x14   : > { %p480_p4 = por %p479_p3, %p478_p2 }
  0x15   : > { %p476_p1 = pneg %p475_p0 }
  0x16   : > { %p482_p6 = por %p481_p5, %p480_p4 }
  0x18   : > { %p483_p8 = pnand %p482_p6, %p476_p1 }
  0x1a   : > { %486 = shalt.err (!%p483_p8)
}
  0x1b   : > { %s487_s20 = scalar_lea.vmem %s640_s5, 64  ;;  %s554_s21 = smov [#allocation3]  }
  0x1c   : > { %p488_p12 = scmp.ne.s32.totalorder %s640_s5, %s487_s20  ;;  %s492_s22 = sshll.u32 %s554_s21, 4  ;;  %s493_s22 = int_to_ptr.vmem [resolvable:$false] %s492_s22 }
  0x1d   : > { %s494_s25 = scalar_lea.vmem %s493_s22, 128  ;;  %p495_p11 = scmp.lt.s32.totalorder %s640_s5, %s493_s22 }
  0x1e   : > { %p490_p0 = pnand %p488_p12, %p474_p13  ;;  %p496_p2 = scmp.lt.s32.totalorder %s494_s25, %s487_s20 }
  0x20   : > { %p491_p10 = pneg %p490_p0  ;;  %p497_p3 = por %p496_p2, %p495_p11 }
  0x22   : > { %p498_p4 = pnand %p497_p3, %p491_p10 }
  0x24   : > { %501 = shalt.err (!%p498_p4)
}
  0x25   : > { %417 = dma.hbm_to_vmem [thread:$0]  (!%p636_p9), %s632_s30, 64, %s640_s5, %s170_s7  }
  0x26   : > { %p717_p1 = scmp.lt.s32.totalorder %s552_s17, 3  ;;  %p718_p5 = scmp.ge.s32.totalorder %s552_s17, 1 }
  0x28   : > { %p188_p13 = pnand %p718_p5, %p717_p1 }
  0x29   : > { %s193_s26 = sand.u32 (!%p188_p13), 1, %s536_s13  }
  0x2a   : > { %191 = sbr.rel (%p188_p13) target bundleno = 248 (0xf8), region = 28  ;;  %s403_s27 = sshll.u32 (!%p188_p13), %s193_s26, 2 }
  0x2b   : > { %s194_s28 = scalar_lea.sflag (!%p188_p13), [#allocation4], %s193_s26  ;;  %s197_s29 = scalar_lea.vmem (!%p188_p13), [#allocation3], %s403_s27 }
  0x31   : > { %527 = dma.done.wait (%p619_p7), %s194_s28, 64  }
  0x32   : > { %529 = vsyncadd (%p619_p7), %s194_s28, 4294967232  ;;  %p239_p10 = scmp.eq.s32.totalorder %s544_s15, 0 }
  0x33   : > { %vm245_vm0 = vcmask (%p239_p10), 3072   ;;  %v555_v0 = vmov (%p239_p10), 0.0  }
  0x34   : > { %244 = sbr.rel (!%p239_p10) target bundleno = 59 (0x3b), region = 36  ;;  %246 = vst.msk [vmem:[#allocation2] sm:$0xf] (%p239_p10), %vm245_vm0, %v555_v0 }
  0x3b PF: > { %v247_v1 = vld [vmem:[%s197_s29] sm:$0xf]  ;;  %vm250_vm1 = vcmask 257024   ;;  %p257_p9 = scmp.eq.s32.totalorder %s544_s15, 1  ;;  %v248_v4 = vld [vmem:[#allocation2] sm:$0xf] }
  0x3c   : > { %v249_v2 = vmul.f32 %v247_v1, %v247_v1  ;;  %vm255_vm2 = vcmask 3072   ;;  %v271_v11 = vld [vmem:[%s711_s1] sm:$0xf] (%p257_p9) }
  0x3d   : > { %v272_v14 = vmul.f32 (%p257_p9), 0.9, %v271_v11 }
  0x3e   : > { %v251_v3 = vsel %vm250_vm1, %v249_v2, 0.0 }
  0x3f   : > { %252 = vadd.xlane.f32.xlu0 %v251_v3 }
  0xc9   : > { %261 = sbr.rel (!%p257_p9) target bundleno = 248 (0xf8), region = 40 }
  0xcc   : > { %v253_v5 = vpop.xlane.xlu0 %252 }
  0xcd   : > { %v254_v6 = vadd.f32 %v253_v5, %v248_v4 }
  0xcf   : > { %256 = vst.msk [vmem:[#allocation2] sm:$0xf] %vm255_vm2, %v254_v6 }
  0xd6   : > { %v262_v7 = vld [vmem:[#allocation2] sm:$0xf] }
  0xd7   : > { %v263_v8 = vmul.f32 0.0625, %v262_v7 }
  0xd9   : > { %468 = vrsqrt.f32 %v263_v8  ;;  %vm266_vm3 = vcmp.eq.f32.partialorder %v263_v8, inf  ;;  %v269_v10 = vand.u32 2147483648, %v263_v8  ;;  %vm268_vm4 = vcmp.eq.f32.partialorder %v263_v8, 0.0 }
  0xe3   : > { %v469_v9 = vpop.eup %468 }
  0xe4   : > { %v265_v12 = vmul.f32 %v469_v9, %v263_v8 }
  0xe6   : > { %v267_v13 = vsel %vm266_vm3, %v263_v8, %v265_v12 }
  0xe7   : > { %v270_v15 = vsel %vm268_vm4, %v269_v10, %v267_v13 }
  0xe8   : > { %v273_v16 = vmul.f32 0.1, %v270_v15 }
  0xea   : > { %v274_v17 = vadd.f32 %v273_v16, %v272_v14 }
  0xec   : > { %275 = vst.msk [vmem:[%s712_s2] sm:$0xf] %vm255_vm2, %v274_v17  ;;  %470 = vrcp.f32 %v274_v17 }
  0xf6   : > { %v471_v18 = vpop.eup %470 }
  0xf7   : > { %277 = vst.msk [vmem:[%s713_s3] sm:$0xf] %vm255_vm2, %v471_v18 }
  0xf8 PF: > { %s17_s17 = sadd.s32 1, %s552_s17   ;;  %s719_s12 = smov %s536_s13 }
  0xf9   : > { %p14_p7 = scmp.ge.s32.totalorder %s17_s17, 4   ;;  %s720_s13 = smov %s540_s14 }
  0xfa   : > { %s721_s14 = smov %s625_s24  ;;  %s722_s15 = smov %s548_s16 }
  0xfb   : > { %s723_s16 = smov %s725_s19  ;;  %16 = sbr.rel (!%p14_p7) target bundleno = 4 (0x4), region = 91 }
 0x102   :  { %311 = vsyncpa [#allocation4], 1 }
 0x103   :  { %313 = vsyncpa [#allocation4 + $0x1], 1 }

</bundles_post_ra>
